<compile_context>
chip_gen: v6e
topology: v6e:2x2x1
jax: 0.10.0
libtpu: 0.0.40
codegen_flags: <defaults>
</compile_context>

<pallas_src>
import jax
import jax.numpy as jnp
from jax.experimental import pallas as pl
from jax.experimental.pallas import tpu as pltpu


def _patch_embed_kernel(x_ref, w_ref, posb_ref, cls_ref, o_ref):
    """One batch element per grid step.

    x_ref:    (1, P, K)   f32   flattened patches for this batch element
    w_ref:    (K, D)      bf16  projection weight (pre-transposed), grid-invariant
    posb_ref: (P, D)      f32   positional embedding with linear bias folded in
    cls_ref:  (1, D)      f32   class token (shared across the batch)
    o_ref:    (1, P+1, D) f32   output tokens for this batch element
    """
    # bf16 cast in-kernel (VPU, hidden under the MXU/pipeline); x travels
    # HBM -> VMEM exactly once, in its native f32.
    x_bf16 = x_ref[0].astype(jnp.bfloat16)                        # (P, K)
    proj = jnp.dot(x_bf16, w_ref[...],
                   preferred_element_type=jnp.float32)            # (P, D), f32 acc
    proj = proj + posb_ref[...]                                   # + (pos + bias)

    # Assemble the full (P+1, D) token block in registers (class token in row 0,
    # patch tokens in rows 1..P) and write it with a single full-tile store.
    # The sublane shift implied by the +1 token offset happens at register level
    # inside the concatenate (XLU shifts), not as masked vst's into the output.
    block = jnp.concatenate([cls_ref[...], proj], axis=0)         # (P+1, D)
    o_ref[0] = block.astype(o_ref.dtype)


def prepare_params(w, b, pos, cls):
    """One-time parameter transform (NOT on the per-call hot path).

    w:   (D, K)    nn.Linear weight (out_features, in_features)
    b:   (D,)      nn.Linear bias
    pos: (1, P, D) learned positional embedding
    cls: (1, D)    class-token parameter (the module stacks B identical copies;
                   the kernel broadcasts instead of DMA'ing a (B, 1, D) copy)
    """
    D = w.shape[0]
    w_kd = w.T.astype(jnp.bfloat16)                           # (K, D) bf16 MXU operand
    posb = (pos[0] + b.reshape(1, D)).astype(jnp.float32)     # (P, D), bias folded in
    cls2d = cls.reshape(1, D).astype(jnp.float32)             # (1, D)
    return w_kd, posb, cls2d


def patch_embedding_layer(x, w_kd, posb, cls2d):
    """x: (B, P, H, W) float32; params from prepare_params(). Returns (B, P+1, D) f32."""
    B, P, H, W = x.shape
    K = H * W
    D = w_kd.shape[1]
    # nn.Flatten(start_dim=2): pure metadata reshape, no copy / no dtype cast here.
    x3 = x.reshape(B, P, K)

    flops = 2 * B * P * K * D
    bytes_accessed = (B * P * K * 4            # x (f32, read once)
                      + K * D * 2              # W^T (bf16)
                      + P * D * 4              # pos + bias
                      + D * 4                  # class token
                      + B * (P + 1) * D * 4)   # output (f32)

    # Output kept f32 to match nn.Linear/PyTorch downstream numerics; emit bf16
    # here only if the rest of the model tolerates it (halves writeback bytes).
    # TODO(synk): at real ViT sizes (P~196-1024, D>=768, large B) process several
    # batch elements per grid step so the MXU M-tile reaches ~256 (v6e/v7x) /
    # 128 (v5e), and sweep pl.Buffered(2/3) on the x BlockSpec; at these toy
    # shapes one batch element per step already bounds per-step VMEM to a few KiB.
    return pl.pallas_call(
        _patch_embed_kernel,
        out_shape=jax.ShapeDtypeStruct((B, P + 1, D), jnp.float32),
        grid=(B,),
        in_specs=[
            pl.BlockSpec((1, P, K), lambda b: (b, 0, 0)),    # x: one batch / step
            pl.BlockSpec((K, D), lambda b: (0, 0)),          # W^T: grid-invariant
            pl.BlockSpec((P, D), lambda b: (0, 0)),          # pos+bias: grid-invariant
            pl.BlockSpec((1, D), lambda b: (0, 0)),          # cls: grid-invariant
        ],
        out_specs=pl.BlockSpec((1, P + 1, D), lambda b: (b, 0, 0)),
        compiler_params=pltpu.CompilerParams(
            dimension_semantics=("parallel",)),              # megacore-shardable
        cost_estimate=pl.CostEstimate(flops=flops, transcendentals=0,
                                      bytes_accessed=bytes_accessed),
    )(x3, w_kd, posb, cls2d)


if __name__ == "__main__":
    # Small shapes consistent with the module's forward:
    #   batch_size=2, num_patches=8, patch spatial 16x16 -> input_dim=256,
    #   embedding_dim=32.
    B, P, H, W = 2, 8, 16, 16
    K = H * W
    D = 32

    key = jax.random.PRNGKey(0)
    kx, kw, kb, kpos, kcls = jax.random.split(key, 5)

    x = jax.random.normal(kx, (B, P, H, W), dtype=jnp.float32)
    # Deterministic synthetic parameters (shapes match nn.Linear / nn.Parameter).
    w = jax.random.normal(kw, (D, K), dtype=jnp.float32) * 0.02      # Linear weight (out, in)
    b = jax.random.normal(kb, (D,), dtype=jnp.float32) * 0.02        # Linear bias
    pos = jax.random.normal(kpos, (1, P, D), dtype=jnp.float32)      # learned pos emb
    cls_single = jax.random.normal(kcls, (1, D), dtype=jnp.float32)  # class token (1, D)

    w_kd, posb, cls2d = prepare_params(w, b, pos, cls_single)
    out = patch_embedding_layer(x, w_kd, posb, cls2d)
    out = jax.block_until_ready(out)
    assert out.shape == (B, P + 1, D)

    # The module's ClassEmbedding parameter is B identical stacked copies of the
    # (1, D) class token; broadcasting reproduces it exactly.
    cls_stacked = jnp.broadcast_to(cls_single[None], (B, 1, D))

    # Reference 1: matches the kernel's precision scheme exactly
    # (bf16 MXU operands, f32 accumulation) -> tight tolerance.
    ref_proj_bf16 = jnp.dot(
        x.reshape(B * P, K).astype(jnp.bfloat16),
        w.T.astype(jnp.bfloat16),
        preferred_element_type=jnp.float32,
    ).reshape(B, P, D)
    ref_bf16 = jnp.concatenate(
        [cls_stacked, ref_proj_bf16 + pos + b.reshape(1, 1, D)], axis=1)
    assert jnp.allclose(out, ref_bf16, atol=1e-4, rtol=1e-4)

    # Reference 2: full-f32 PyTorch semantics -> loose tolerance (bf16 operand rounding).
    ref_f32 = jnp.concatenate([cls_stacked, x.reshape(B, P, K) @ w.T + b + pos], axis=1)
    assert jnp.allclose(out, ref_f32, atol=3e-2, rtol=3e-2)

    print("KERNEL_OK")
</pallas_src>

<mosaic_0001>
module attributes {stable_mosaic.version = 11 : i64} {
  func.func @_patch_embed_kernel(%arg0: i32, %arg1: memref<1x8x256xf32, #tpu.memory_space<vmem>>, %arg2: memref<256x32xbf16, #tpu.memory_space<vmem>>, %arg3: memref<8x32xf32, #tpu.memory_space<vmem>>, %arg4: memref<1x32xf32, #tpu.memory_space<vmem>>, %arg5: memref<1x9x32xf32, #tpu.memory_space<vmem>>) attributes {dimension_semantics = [#tpu.dimension_semantics<parallel>], iteration_bounds = array<i64: 2>, scalar_prefetch = 0 : i64, scratch_operands = 0 : i64, tpu.core_type = #tpu.core_type<tc>, window_params = [{transform_indices = @transform_0, window_bounds = array<i64: 1, 8, 256>}, {pipeline_mode = #tpu.pipeline_mode<synchronous>, transform_indices = @transform_1, window_bounds = array<i64: 256, 32>}, {pipeline_mode = #tpu.pipeline_mode<synchronous>, transform_indices = @transform_2, window_bounds = array<i64: 8, 32>}, {pipeline_mode = #tpu.pipeline_mode<synchronous>, transform_indices = @transform_3, window_bounds = array<i64: 1, 32>}, {transform_indices = @transform_4, window_bounds = array<i64: 1, 9, 32>}]} {
    %c0 = arith.constant 0 : index
    %c0_0 = arith.constant 0 : index
    %c0_1 = arith.constant 0 : index
    %0 = vector.load %arg1[%c0, %c0_0, %c0_1] : memref<1x8x256xf32, #tpu.memory_space<vmem>>, vector<1x8x256xf32>
    %1 = vector.shape_cast %0 : vector<1x8x256xf32> to vector<8x256xf32>
    %2 = arith.truncf %1 : vector<8x256xf32> to vector<8x256xbf16>
    %c0_2 = arith.constant 0 : index
    %c0_3 = arith.constant 0 : index
    %3 = vector.load %arg2[%c0_2, %c0_3] : memref<256x32xbf16, #tpu.memory_space<vmem>>, vector<256x32xbf16>
    %cst = arith.constant dense<0.000000e+00> : vector<8x32xf32>
    %4 = tpu.matmul %2, %3, %cst {dimension_numbers = #tpu.dot_dimension_numbers<[1], [0], [0], [1], [0, 0, 1, 1], [], []>} : vector<8x256xbf16>, vector<256x32xbf16>, vector<8x32xf32> -> vector<8x32xf32>
    %c0_4 = arith.constant 0 : index
    %c0_5 = arith.constant 0 : index
    %5 = vector.load %arg3[%c0_4, %c0_5] : memref<8x32xf32, #tpu.memory_space<vmem>>, vector<8x32xf32>
    %6 = arith.addf %4, %5 : vector<8x32xf32>
    %c0_6 = arith.constant 0 : index
    %c0_7 = arith.constant 0 : index
    %7 = vector.load %arg4[%c0_6, %c0_7] : memref<1x32xf32, #tpu.memory_space<vmem>>, vector<1x32xf32>
    %8 = tpu.concatenate %7, %6 in 0 : vector<1x32xf32>, vector<8x32xf32> -> vector<9x32xf32>
    %c0_8 = arith.constant 0 : index
    %c0_9 = arith.constant 0 : index
    %c0_10 = arith.constant 0 : index
    %9 = vector.load %arg5[%c0_8, %c0_9, %c0_10] : memref<1x9x32xf32, #tpu.memory_space<vmem>>, vector<1x9x32xf32>
    %10 = vector.shape_cast %9 : vector<1x9x32xf32> to vector<9x32xf32>
    %11 = vector.shape_cast %8 : vector<9x32xf32> to vector<1x9x32xf32>
    tpu.vector_store %arg5[%c0_8, %c0_9, %c0_10], %11 {strides = array<i32>} : memref<1x9x32xf32, #tpu.memory_space<vmem>>, vector<1x9x32xf32>,
    return
  }
  func.func @transform_0(%arg0: i32) -> (i32, i32, i32) {
    %c0_i32 = arith.constant 0 : i32
    %c0_i32_0 = arith.constant 0 : i32
    %c0_i32_1 = arith.constant 0 : i32
    return %arg0, %c0_i32, %c0_i32_0 : i32, i32, i32
  }
  func.func @transform_1(%arg0: i32) -> (i32, i32) {
    %c0_i32 = arith.constant 0 : i32
    %c0_i32_0 = arith.constant 0 : i32
    %c0_i32_1 = arith.constant 0 : i32
    return %c0_i32, %c0_i32_0 : i32, i32
  }
  func.func @transform_2(%arg0: i32) -> (i32, i32) {
    %c0_i32 = arith.constant 0 : i32
    %c0_i32_0 = arith.constant 0 : i32
    %c0_i32_1 = arith.constant 0 : i32
    return %c0_i32, %c0_i32_0 : i32, i32
  }
  func.func @transform_3(%arg0: i32) -> (i32, i32) {
    %c0_i32 = arith.constant 0 : i32
    %c0_i32_0 = arith.constant 0 : i32
    %c0_i32_1 = arith.constant 0 : i32
    return %c0_i32, %c0_i32_0 : i32, i32
  }
  func.func @transform_4(%arg0: i32) -> (i32, i32, i32) {
    %c0_i32 = arith.constant 0 : i32
    %c0_i32_0 = arith.constant 0 : i32
    %c0_i32_1 = arith.constant 0 : i32
    return %arg0, %c0_i32, %c0_i32_0 : i32, i32, i32
  }
}

</mosaic_0001>

<bundles_post_ra>
// kernel: tpu_custom_call.1
= control target key start
LH: loop header
LB: loop body
LE: loop exit
PB: predicated region body
PF: predicated region fallthrough
CT: control target
= control target key end

     0   :  { %s545_s15 = smov 0   ;;  %s623_s0 = inlined_call_operand.vmem [shape: f32[2,8,256], index: 0, kind: input, shape index: {}]   ;;  %s624_s1 = inlined_call_operand.vmem [shape: bf16[256,32], index: 1, kind: input, shape index: {}]   ;;  %s625_s2 = inlined_call_operand.vmem [shape: f32[8,32], index: 2, kind: input, shape index: {}]   ;;  %s626_s3 = inlined_call_operand.vmem [shape: f32[1,32], index: 3, kind: input, shape index: {}]   ;;  %s627_s4 = inlined_call_operand.vmem [shape: f32[2,9,32], index: 4, kind: output, shape index: {}]  }
   0x1 LB: > { %s437_s16 = sadd.s32 4294967295, %s518_s15   ;;  %p441_p0 = scmp.ge.s32.totalorder %s518_s15, 1  ;;  %s518_s15 = sphi %s545_s15, %s14_s15  }
   0x2   : > { %p162_p1 = scmp.lt.s32.totalorder %s518_s15, 3 }
   0x4   : > { %p163_p2 = pnand %p441_p0, %p162_p1 }
   0x5   : > { %p188_p3 = scmp.lt.s32.totalorder (!%p163_p2), %s437_s16, 1 }
   0x6   : > { %166 = sbr.rel (%p163_p2) target bundleno = 247 (0xf7), region = 36 }
   0xb   : > { %v496_v0 = vld [vmem:[%s624_s1 + $0x78] sm:$0xff]   ;;  %v498_v2 = vld [vmem:[%s624_s1 + $0x70] sm:$0xff]   ;;  %v500_v4 = vld [vmem:[%s624_s1 + $0x68] sm:$0xff]   ;;  %s629_s16 = smov (!%p188_p3, %s437_s16), 1  ;;  %vm376_vm0 = vcmask 1040384   ;;  %vm380_vm1 = vcmask 253952  }
   0xc   : > { %v497_v1 = vld [vmem:[%s624_s1 + $0x38] sm:$0xff]   ;;  %466 = vmatprep.subr.bf16.mxu0 %v496_v0  ;;  %v499_v3 = vld [vmem:[%s624_s1 + $0x30] sm:$0xff]   ;;  %v501_v5 = vld [vmem:[%s624_s1 + $0x28] sm:$0xff]   ;;  %s464_s5 = sshll.u32 %s629_s16, 4  ;;  %vm378_vm2 = vcmask 261120  }
   0xd   : > { %467 = vmatpush3.bf16.msra.mxu0 %v497_v1  ;;  %v502_v6 = vld [vmem:[%s624_s1 + $0x60] sm:$0xff]   ;;  %v504_v8 = vld [vmem:[%s624_s1 + $0x58] sm:$0xff]   ;;  %s192_s12 = scalar_lea.vmem %s623_s0, %s464_s5  ;;  %v506_v10 = vld [vmem:[%s624_s1 + $0x50] sm:$0xff]   ;;  %s197_s8 = scalar_lea.vmem %s627_s4, %s464_s5 }
   0xe   : > { %468 = vmatprep.subr.bf16.mxu0 %v498_v2  ;;  %v503_v7 = vld [vmem:[%s624_s1 + $0x20] sm:$0xff]   ;;  %v505_v9 = vld [vmem:[%s624_s1 + $0x18] sm:$0xff]   ;;  %v200_v11 = vld [vmem:[%s192_s12 + $0x8] sm:$0xff] }
   0xf   : > { %v202_v12 = vpack.c.bf16 %v200_v11, %v200_v11  ;;  %v507_v13 = vld [vmem:[%s624_s1 + $0x10] sm:$0xff]   ;;  %v508_v14 = vld [vmem:[%s624_s1 + $0x48] sm:$0xff]   ;;  %v510_v16 = vld [vmem:[%s624_s1 + $0x40] sm:$0xff]  }
  0x10   : > { %v509_v15 = vld [vmem:[%s624_s1 + $0x8] sm:$0xff]   ;;  %v511_v17 = vld [vmem:[%s624_s1] sm:$0xff]  }
  0x11   : > { %469 = vmatpush3.bf16.msra.mxu0 %v499_v3  ;;  %364 = vmatprep.mubr.bf16.mxu0 %v202_v12  ;;  %v199_v18 = vld [vmem:[%s192_s12] sm:$0xff] }
  0x12   : > { %470 = vmatprep.subr.bf16.mxu0 %v500_v4  ;;  %v201_v19 = vpack.c.bf16 %v199_v18, %v199_v18  ;;  %v235_v21 = vld [vmem:[%s625_s2] sm:$0xff] }
  0x13   : > { %v372_v26 = vld [vmem:[%s626_s3] sm:$0x1] }
  0x15   : > { %471 = vmatpush3.bf16.msra.mxu0 %v501_v5 }
  0x16   : > { %472 = vmatprep.subr.bf16.mxu0 %v502_v6 }
  0x19   : > { %473 = vmatpush3.bf16.msra.mxu0 %v503_v7 }
  0x1a   : > { %474 = vmatprep.subr.bf16.mxu0 %v504_v8 }
  0x1d   : > { %475 = vmatpush3.bf16.msra.mxu0 %v505_v9 }
  0x1e   : > { %476 = vmatprep.subr.bf16.mxu0 %v506_v10 }
  0x21   : > { %477 = vmatpush3.bf16.msra.mxu0 %v507_v13 }
  0x22   : > { %478 = vmatprep.subr.bf16.mxu0 %v508_v14 }
  0x25   : > { %479 = vmatpush3.bf16.msra.mxu0 %v509_v15 }
  0x26   : > { %480 = vmatprep.subr.bf16.mxu0 %v510_v16 }
  0x29   : > { %481 = vmatpush3.bf16.msra.mxu0 %v511_v17 }
  0x2c   : > { %365 = vmatmul.mubr.bf16.vlgmr.msra.gmra.mxu0 %v201_v19 }
  0xec   : > { %v482_v20 = vpop.f32.mrf.mxu0 }
  0xee   : > { %v483_v22 = vpop.f32.mrf.mxu0 }
  0xef   : > { %v484_v23 = vadd.f32 %v483_v22, %v482_v20 }
  0xf0   : > { %v485_v24 = vpop.f32.mrf.mxu0 }
  0xf1   : > { %v367_v25 = vadd.f32 %v484_v23, %v235_v21 }
  0xf2   : > { %v486_v27 = vpop.f32.mrf.mxu0 }
  0xf3   : > { %v374_v28 = vrot.slane %v367_v25, 7 }
  0xf5   : > { %v377_v29 = vsel %vm376_vm0, %v372_v26, %v374_v28  ;;  %381 = vst.msk [vmem:[%s197_s8 + $0x8] sm:$0x1] %vm380_vm1, %v374_v28 }
  0xf6   : > { %379 = vst.msk [vmem:[%s197_s8] sm:$0xff] %vm378_vm2, %v377_v29 }
  0xf7 PF: > { %s14_s15 = sadd.s32 1, %s518_s15  }
  0xf8   : > { %p11_p4 = scmp.ge.s32.totalorder %s14_s15, 4  }
  0xfa   :  { %13 = sbr.rel (!%p11_p4) target bundleno = 1 (0x1), region = 66 }

</bundles_post_ra>
